<compile_context>
chip_gen: v5e
topology: v5e:2x2
jax: 0.10.0
libtpu: 0.0.40
codegen_flags: <defaults>
</compile_context>

<pallas_src>
import jax
import jax.numpy as jnp
import numpy as np
from jax.experimental import pallas as pl
from jax.experimental.pallas import tpu as pltpu


# ----------------------------------------------------------------------------
# HOG descriptor + min/max norm + concat kernel (all VPU/XLU, no MXU)
# ----------------------------------------------------------------------------
def _hog_concat_kernel(x_ref, o_ref):
    """x_ref: (1,3,H,W) f32; o_ref: (1,4,H,W) f32.

    Output channels 0..2 = input image, channel 3 = normalized HOG magnitude
    (exact semantics of BaseEncoder.forward with aux_hog=True up to the
    encoder call).
    """
    x = x_ref[0]                      # (3, H, W)
    C, H, W = x.shape                 # static python ints

    # Zero-padded one-pixel shifts (reproduce F.conv2d padding='same'):
    #   even kernel (ks=2): pad 0 before / 1 after;  ks=3: pad 1 both sides.
    zrow = jnp.zeros((C, 1, W), jnp.float32)
    zcol = jnp.zeros((C, H, 1), jnp.float32)
    x_hp1 = jnp.concatenate([x[:, 1:, :], zrow], axis=1)   # x[h+1]
    x_hm1 = jnp.concatenate([zrow, x[:, :-1, :]], axis=1)  # x[h-1]
    x_wp1 = jnp.concatenate([x[:, :, 1:], zcol], axis=2)   # x[w+1]
    x_wm1 = jnp.concatenate([zcol, x[:, :, :-1]], axis=2)  # x[w-1]

    # ks=2: hd = x[h]-x[h+1],  vd = x[w+1]-x[w]
    # ks=3: hd = x[h-1]-x[h+1], vd = x[w+1]-x[w-1]
    # Channel max over the 3 depthwise conv outputs (reduce over leading dim).
    hd2 = jnp.max(x - x_hp1, axis=0)
    vd2 = jnp.max(x_wp1 - x, axis=0)
    hd3 = jnp.max(x_hm1 - x_hp1, axis=0)
    vd3 = jnp.max(x_wp1 - x_wm1, axis=0)

    mag2 = jnp.sqrt(vd2 * vd2 + hd2 * hd2)   # HOG_descriptor(x, ks=2)
    mag3 = jnp.sqrt(vd3 * vd3 + hd3 * hd3)   # HOG_descriptor(x, ks=3)
    hog = jnp.sqrt(jnp.maximum(mag2, mag3))

    # HOG_max_min_norm: spatial min/max normalization.
    # Single (1,1) reciprocal (EUP) + Newton refinement, then a VPU multiply,
    # instead of H*W divides.  (No epsilon, matching the original module.)
    mx = jnp.max(hog, axis=(0, 1), keepdims=True)
    mn = jnp.min(hog, axis=(0, 1), keepdims=True)
    d = mx - mn
    inv = pl.reciprocal(d, approx=True)
    inv = inv * (2.0 - d * inv)              # Newton step 1
    inv = inv * (2.0 - d * inv)              # Newton step 2 -> ~f32 exact
    hog_n = (hog - mn) * inv

    o_ref[0, 0:3, :, :] = x                  # bulk RGB copy (no per-channel loop)
    o_ref[0, 3] = hog_n


def hog_concat(x):
    """x: (N,3,H,W) float32 -> (N,4,H,W) float32 ([rgb, normalized HOG])."""
    N, C, H, W = x.shape
    assert C == 3
    return pl.pallas_call(
        _hog_concat_kernel,
        out_shape=jax.ShapeDtypeStruct((N, 4, H, W), jnp.float32),
        grid_spec=pltpu.PrefetchScalarGridSpec(
            num_scalar_prefetch=0,
            grid=(N,),
            in_specs=[pl.BlockSpec((1, 3, H, W), lambda n: (n, 0, 0, 0))],
            out_specs=pl.BlockSpec((1, 4, H, W), lambda n: (n, 0, 0, 0)),
        ),
        compiler_params=pltpu.CompilerParams(
            dimension_semantics=("parallel",),          # batch is independent
            vmem_limit_bytes=64 * 1024 * 1024,
        ),
    )(x)


# ----------------------------------------------------------------------------
# Synthetic encoder stage: 2x2 stride-2 conv + ReLU as two row-parity matmuls
# (NHWC activations, bf16 MXU operands, f32 accumulation).
# ----------------------------------------------------------------------------
def _patch_matmul_kernel(xt_ref, xb_ref, w_ref, b_ref, o_ref):
    xt = xt_ref[...].astype(jnp.bfloat16)
    xb = xb_ref[...].astype(jnp.bfloat16)
    acc = jnp.dot(xt, w_ref[0], preferred_element_type=jnp.float32)
    acc = acc + jnp.dot(xb, w_ref[1], preferred_element_type=jnp.float32)
    acc = acc + b_ref[...]
    o_ref[...] = jnp.maximum(acc, 0.0).astype(o_ref.dtype)


def patch_matmul_bias_relu(x_top, x_bot, w, b, out_dtype=jnp.bfloat16):
    """relu(x_top @ w[0] + x_bot @ w[1] + b).  x_*: (M,K); w: (2,K,Cout)."""
    M, K = x_top.shape
    _, _, Cout = w.shape
    tm = min(M, 4096)                 # large row tiles: amortize pipeline overhead
    # NOTE: Cout < 128 makes the output store lane-masked; fully lane-dense
    # output would require fusing the next stage's patchify into this kernel.
    return pl.pallas_call(
        _patch_matmul_kernel,
        out_shape=jax.ShapeDtypeStruct((M, Cout), out_dtype),
        grid_spec=pltpu.PrefetchScalarGridSpec(
            num_scalar_prefetch=0,
            grid=(pl.cdiv(M, tm),),
            in_specs=[
                pl.BlockSpec((tm, K), lambda i: (i, 0)),
                pl.BlockSpec((tm, K), lambda i: (i, 0)),
                pl.BlockSpec((2, K, Cout), lambda i: (0, 0, 0)),
                pl.BlockSpec((1, Cout), lambda i: (0, 0)),
            ],
            out_specs=pl.BlockSpec((tm, Cout), lambda i: (i, 0)),
        ),
        compiler_params=pltpu.CompilerParams(
            dimension_semantics=("parallel",),
            vmem_limit_bytes=64 * 1024 * 1024,
        ),
    )(x_top, x_bot, w, b.reshape(1, Cout))


def conv2x2_s2_stage(h_nhwc, w, b):
    """2x2 stride-2 conv + ReLU on an NHWC activation.

    The row-parity slices h[:, 0::2] / h[:, 1::2] turn the 2x2 patchify into
    pure reshapes (no transposes) with the patch features laid out as
    (dw, c) per row parity; w has shape (2, 2*C, Cout) indexed by dh.
    """
    N, H, W, C = h_nhwc.shape
    assert H % 2 == 0 and W % 2 == 0
    M = N * (H // 2) * (W // 2)
    x_top = h_nhwc[:, 0::2].reshape(M, 2 * C)
    x_bot = h_nhwc[:, 1::2].reshape(M, 2 * C)
    out = patch_matmul_bias_relu(x_top, x_bot, w, b)
    return out.reshape(N, H // 2, W // 2, -1)


# ----------------------------------------------------------------------------
# BaseEncoder equivalent
# ----------------------------------------------------------------------------
class BaseEncoderPallas:
    def __init__(self, aux_hog=True, stage_channels=(16, 32, 64), seed=42):
        self.aux_hog = aux_hog
        in_ch = 4 if aux_hog else 3
        key = jax.random.PRNGKey(seed)
        self.params = []
        c_in = in_ch
        for c_out in stage_channels:
            key, kw, kb = jax.random.split(key, 3)
            # weight layout: (dh, dw*C + c, c_out); stored bf16 (MXU operand).
            w = (jax.random.normal(kw, (2, 2 * c_in, c_out), jnp.float32)
                 / np.sqrt(4 * c_in)).astype(jnp.bfloat16)
            b = 0.01 * jax.random.normal(kb, (c_out,), jnp.float32)
            self.params.append((w, b))
            c_in = c_out
        self.out_channels = list(stage_channels)

    def __call__(self, x):
        """x: (N,3,H,W) f32 -> list of NHWC bf16 feature maps."""
        if self.aux_hog:
            x = hog_concat(x)                               # (N,4,H,W) f32
        # Single layout conversion to channels-last + bf16; all stages then run
        # NHWC with no further transposes and half the HBM traffic.
        h = jnp.transpose(x, (0, 2, 3, 1)).astype(jnp.bfloat16)
        fms = []
        for w, b in self.params:
            h = conv2x2_s2_stage(h, w, b)
            fms.append(h)
        return fms


# ----------------------------------------------------------------------------
# Pure-JAX reference for the HOG path (correctness check of the Pallas kernel)
# ----------------------------------------------------------------------------
def _hog_reference(x):
    xp = jnp.pad(x, ((0, 0), (0, 0), (1, 1), (1, 1)))
    c = xp[:, :, 1:-1, 1:-1]
    nh = xp[:, :, 2:, 1:-1]
    ph = xp[:, :, :-2, 1:-1]
    nw = xp[:, :, 1:-1, 2:]
    pw = xp[:, :, 1:-1, :-2]

    def mag(hd, vd):
        h = jnp.max(hd, axis=1, keepdims=True)
        v = jnp.max(vd, axis=1, keepdims=True)
        return jnp.sqrt(v * v + h * h)

    m2 = mag(c - nh, nw - c)    # ks=2
    m3 = mag(ph - nh, nw - pw)  # ks=3
    hog = jnp.sqrt(jnp.maximum(m2, m3))
    mx = jnp.max(hog, axis=(2, 3), keepdims=True)
    mn = jnp.min(hog, axis=(2, 3), keepdims=True)
    return (hog - mn) / (mx - mn)


if __name__ == "__main__":
    key = jax.random.PRNGKey(0)
    N, C, H, W = 2, 3, 16, 16
    x = jax.random.uniform(key, (N, C, H, W), dtype=jnp.float32)

    # HOG + concat Pallas kernel vs pure-JAX reference.
    xc = jax.block_until_ready(hog_concat(x))
    ref = _hog_reference(x)
    np.testing.assert_allclose(np.asarray(xc[:, :3]), np.asarray(x), rtol=1e-6, atol=1e-6)
    np.testing.assert_allclose(np.asarray(xc[:, 3:4]), np.asarray(ref), rtol=1e-4, atol=1e-5)

    # Non-square image exercises the H- and W-shift paths independently.
    x2 = jax.random.uniform(jax.random.PRNGKey(1), (1, 3, 32, 16), dtype=jnp.float32)
    xc2 = jax.block_until_ready(hog_concat(x2))
    np.testing.assert_allclose(np.asarray(xc2[:, 3:4]), np.asarray(_hog_reference(x2)),
                               rtol=1e-4, atol=1e-5)

    # Full forward (HOG concat + synthetic 3-stage encoder).
    enc = BaseEncoderPallas(aux_hog=True)
    fms = enc(x)
    for fm in fms:
        jax.block_until_ready(fm)
    assert [tuple(fm.shape) for fm in fms] == [(2, 8, 8, 16), (2, 4, 4, 32), (2, 2, 2, 64)]
    assert all(bool(jnp.isfinite(fm.astype(jnp.float32)).all()) for fm in fms)

    print("KERNEL_OK")
</pallas_src>

<mosaic_0001>
module attributes {stable_mosaic.version = 11 : i64} {
  func.func @_hog_concat_kernel(%arg0: i32, %arg1: memref<1x3x16x16xf32, #tpu.memory_space<vmem>>, %arg2: memref<1x4x16x16xf32, #tpu.memory_space<vmem>>) attributes {dimension_semantics = [#tpu.dimension_semantics<parallel>], iteration_bounds = array<i64: 2>, scalar_prefetch = 0 : i64, scratch_operands = 0 : i64, tpu.core_type = #tpu.core_type<tc>, window_params = [{transform_indices = @transform_0, window_bounds = array<i64: 1, 3, 16, 16>}, {transform_indices = @transform_1, window_bounds = array<i64: 1, 4, 16, 16>}]} {
    %c0 = arith.constant 0 : index
    %c0_0 = arith.constant 0 : index
    %c0_1 = arith.constant 0 : index
    %c0_2 = arith.constant 0 : index
    %0 = vector.load %arg1[%c0, %c0_0, %c0_1, %c0_2] : memref<1x3x16x16xf32, #tpu.memory_space<vmem>>, vector<1x3x16x16xf32>
    %1 = vector.shape_cast %0 : vector<1x3x16x16xf32> to vector<3x16x16xf32>
    %cst = arith.constant 0.000000e+00 : f32
    %2 = vector.broadcast %cst : f32 to vector<3x1x16xf32>
    %cst_3 = arith.constant 0.000000e+00 : f32
    %3 = vector.broadcast %cst_3 : f32 to vector<3x16x1xf32>
    %4 = vector.extract_strided_slice %1 {offsets = [0, 1, 0], sizes = [3, 15, 16], strides = [1, 1, 1]} : vector<3x16x16xf32> to vector<3x15x16xf32>
    %5 = tpu.concatenate %4, %2 in 1 : vector<3x15x16xf32>, vector<3x1x16xf32> -> vector<3x16x16xf32>
    %6 = vector.extract_strided_slice %1 {offsets = [0, 0, 0], sizes = [3, 15, 16], strides = [1, 1, 1]} : vector<3x16x16xf32> to vector<3x15x16xf32>
    %7 = tpu.concatenate %2, %6 in 1 : vector<3x1x16xf32>, vector<3x15x16xf32> -> vector<3x16x16xf32>
    %8 = vector.extract_strided_slice %1 {offsets = [0, 0, 1], sizes = [3, 16, 15], strides = [1, 1, 1]} : vector<3x16x16xf32> to vector<3x16x15xf32>
    %9 = tpu.concatenate %8, %3 in 2 : vector<3x16x15xf32>, vector<3x16x1xf32> -> vector<3x16x16xf32>
    %10 = vector.extract_strided_slice %1 {offsets = [0, 0, 0], sizes = [3, 16, 15], strides = [1, 1, 1]} : vector<3x16x16xf32> to vector<3x16x15xf32>
    %11 = tpu.concatenate %3, %10 in 2 : vector<3x16x1xf32>, vector<3x16x15xf32> -> vector<3x16x16xf32>
    %12 = arith.subf %1, %5 : vector<3x16x16xf32>
    %cst_4 = arith.constant dense<0xFF800000> : vector<16x16xf32>
    %13 = vector.multi_reduction <maximumf>, %12, %cst_4 [0] : vector<3x16x16xf32> to vector<16x16xf32>
    %14 = arith.subf %9, %1 : vector<3x16x16xf32>
    %cst_5 = arith.constant dense<0xFF800000> : vector<16x16xf32>
    %15 = vector.multi_reduction <maximumf>, %14, %cst_5 [0] : vector<3x16x16xf32> to vector<16x16xf32>
    %16 = arith.subf %7, %5 : vector<3x16x16xf32>
    %cst_6 = arith.constant dense<0xFF800000> : vector<16x16xf32>
    %17 = vector.multi_reduction <maximumf>, %16, %cst_6 [0] : vector<3x16x16xf32> to vector<16x16xf32>
    %18 = arith.subf %9, %11 : vector<3x16x16xf32>
    %cst_7 = arith.constant dense<0xFF800000> : vector<16x16xf32>
    %19 = vector.multi_reduction <maximumf>, %18, %cst_7 [0] : vector<3x16x16xf32> to vector<16x16xf32>
    %20 = arith.mulf %15, %15 : vector<16x16xf32>
    %21 = arith.mulf %13, %13 : vector<16x16xf32>
    %22 = arith.addf %20, %21 : vector<16x16xf32>
    %23 = math.sqrt %22 : vector<16x16xf32>
    %24 = arith.mulf %19, %19 : vector<16x16xf32>
    %25 = arith.mulf %17, %17 : vector<16x16xf32>
    %26 = arith.addf %24, %25 : vector<16x16xf32>
    %27 = math.sqrt %26 : vector<16x16xf32>
    %28 = arith.maximumf %23, %27 : vector<16x16xf32>
    %29 = math.sqrt %28 : vector<16x16xf32>
    %30 = vector.shape_cast %29 : vector<16x16xf32> to vector<1x16x16xf32>
    %cst_8 = arith.constant dense<0xFF800000> : vector<1xf32>
    %31 = vector.multi_reduction <maximumf>, %30, %cst_8 [1, 2] : vector<1x16x16xf32> to vector<1xf32>
    %32 = vector.shape_cast %31 : vector<1xf32> to vector<1x1x1xf32>
    %33 = vector.extract %32[0, 0, 0] : f32 from vector<1x1x1xf32>
    %34 = vector.broadcast %33 : f32 to vector<1x1xf32>
    %35 = vector.shape_cast %29 : vector<16x16xf32> to vector<1x16x16xf32>
    %cst_9 = arith.constant dense<0x7F800000> : vector<1xf32>
    %36 = vector.multi_reduction <minimumf>, %35, %cst_9 [1, 2] : vector<1x16x16xf32> to vector<1xf32>
    %37 = vector.shape_cast %36 : vector<1xf32> to vector<1x1x1xf32>
    %38 = vector.extract %37[0, 0, 0] : f32 from vector<1x1x1xf32>
    %39 = vector.broadcast %38 : f32 to vector<1x1xf32>
    %40 = arith.subf %34, %39 : vector<1x1xf32>
    %41 = tpu.reciprocal %40 {approx = true} : vector<1x1xf32> -> vector<1x1xf32>
    %42 = arith.mulf %40, %41 : vector<1x1xf32>
    %cst_10 = arith.constant 2.000000e+00 : f32
    %43 = vector.broadcast %cst_10 : f32 to vector<1x1xf32>
    %44 = arith.subf %43, %42 : vector<1x1xf32>
    %45 = arith.mulf %41, %44 : vector<1x1xf32>
    %46 = arith.mulf %40, %45 : vector<1x1xf32>
    %cst_11 = arith.constant 2.000000e+00 : f32
    %47 = vector.broadcast %cst_11 : f32 to vector<1x1xf32>
    %48 = arith.subf %47, %46 : vector<1x1xf32>
    %49 = arith.mulf %45, %48 : vector<1x1xf32>
    %50 = vector.broadcast %39 : vector<1x1xf32> to vector<16x16xf32>
    %51 = arith.subf %29, %50 : vector<16x16xf32>
    %52 = vector.broadcast %49 : vector<1x1xf32> to vector<16x16xf32>
    %53 = arith.mulf %51, %52 : vector<16x16xf32>
    %c0_12 = arith.constant 0 : index
    %c0_13 = arith.constant 0 : index
    %c0_14 = arith.constant 0 : index
    %c0_15 = arith.constant 0 : index
    %54 = vector.load %arg2[%c0_12, %c0_13, %c0_14, %c0_15] : memref<1x4x16x16xf32, #tpu.memory_space<vmem>>, vector<1x3x16x16xf32>
    %55 = vector.shape_cast %54 : vector<1x3x16x16xf32> to vector<3x16x16xf32>
    %56 = vector.shape_cast %1 : vector<3x16x16xf32> to vector<1x3x16x16xf32>
    tpu.vector_store %arg2[%c0_12, %c0_13, %c0_14, %c0_15], %56 {strides = array<i32>} : memref<1x4x16x16xf32, #tpu.memory_space<vmem>>, vector<1x3x16x16xf32>,
    %c0_16 = arith.constant 0 : index
    %c3 = arith.constant 3 : index
    %c0_17 = arith.constant 0 : index
    %c0_18 = arith.constant 0 : index
    %57 = vector.load %arg2[%c0_16, %c3, %c0_17, %c0_18] : memref<1x4x16x16xf32, #tpu.memory_space<vmem>>, vector<1x1x16x16xf32>
    %58 = vector.shape_cast %57 : vector<1x1x16x16xf32> to vector<16x16xf32>
    %59 = vector.shape_cast %53 : vector<16x16xf32> to vector<1x1x16x16xf32>
    tpu.vector_store %arg2[%c0_16, %c3, %c0_17, %c0_18], %59 {strides = array<i32>} : memref<1x4x16x16xf32, #tpu.memory_space<vmem>>, vector<1x1x16x16xf32>,
    return
  }
  func.func @transform_0(%arg0: i32) -> (i32, i32, i32, i32) {
    %c0_i32 = arith.constant 0 : i32
    %c0_i32_0 = arith.constant 0 : i32
    %c0_i32_1 = arith.constant 0 : i32
    %c0_i32_2 = arith.constant 0 : i32
    return %arg0, %c0_i32, %c0_i32_0, %c0_i32_1 : i32, i32, i32, i32
  }
  func.func @transform_1(%arg0: i32) -> (i32, i32, i32, i32) {
    %c0_i32 = arith.constant 0 : i32
    %c0_i32_0 = arith.constant 0 : i32
    %c0_i32_1 = arith.constant 0 : i32
    %c0_i32_2 = arith.constant 0 : i32
    return %arg0, %c0_i32, %c0_i32_0, %c0_i32_1 : i32, i32, i32, i32
  }
}

</mosaic_0001>

<bundles_post_ra>
// kernel: tpu_custom_call.1
= control target key start
LH: loop header
LB: loop body
LE: loop exit
PB: predicated region body
PF: predicated region fallthrough
CT: control target
= control target key end

     0   :  { %6 = vsyncpa [#allocation3], 0  ;;  %s995_s0 = inlined_call_operand.hbm [shape: f32[2,3,16,16], index: 0, kind: input, shape index: {}]   ;;  %s996_s1 = inlined_call_operand.hbm [shape: f32[2,4,16,16], index: 1, kind: output, shape index: {}]  }
   0x1   :  { %8 = vsyncpa [#allocation3 + $0x1], 0 }
   0x2   :  { %9 = vsyncpa [#allocation4], 0 }
   0x3   :  { %11 = vsyncpa [#allocation4 + $0x1], 0  ;;  %s725_s6 = smov 0   ;;  %s727_s7 = smov 0  }
   0x4   :  { %s729_s8 = smov 0   ;;  %s731_s9 = smov 0  }
   0x5 LB: > { %s746_s10 = sadd.s32 4294967295, %s707_s9   ;;  %s524_s11 = sadd.s32 4294967294, %s707_s9   ;;  %s707_s9 = sphi %s731_s9, %s1004_s9   ;;  %s703_s8 = sphi %s729_s8, %s1003_s8   ;;  %s699_s7 = sphi %s727_s7, %s1002_s7   ;;  %s695_s6 = sphi %s725_s6, %s1001_s6  }
   0x6   : > { %s750_s12 = sadd.s32 1, %s707_s9   ;;  %s24_s13 = sadd.s32 1, %s703_s8 }
   0x7   : > { %s21_s14 = ssub.s32 %s707_s9, %s750_s12  ;;  %p31_p0 = scmp.ne.s32.totalorder %s703_s8, %s699_s7 }
   0x8   : > { %p22_p1 = scmp.eq.s32.totalorder %s21_s14, 0  ;;  %p32_p2 = scmp.eq.s32.totalorder %s707_s9, 0 }
   0x9   : > { %p37_p3 = scmp.ne.s32.totalorder %s699_s7, %s695_s6  ;;  %p38_p4 = scmp.eq.s32.totalorder %s746_s10, 0 }
   0xa   : > { %s762_s15 = scalar_select %p22_p1, %s703_s8, %s24_s13  }
   0xb   : > { %p33_p5 = por %p32_p2, %p31_p0  ;;  %p764_p6 = por %p38_p4, %p37_p3 }
   0xc   : > { %p61_p7 = scmp.eq.s32.totalorder %s746_s10, 1  ;;  %p67_p8 = scmp.eq.s32.totalorder %s524_s11, 1 }
   0xd   : > { %p526_p9 = scmp.ge.s32.totalorder %s707_s9, 2  ;;  %p557_p10 = scmp.lt.s32.totalorder %s707_s9, 2 }
   0xe   : > { %p771_p11 = por %p61_p7, %p31_p0  ;;  %p775_p12 = por %p67_p8, %p37_p3 }
   0xf   : > { %s87_s19 = sand.u32 1, %s703_s8   ;;  %s539_s20 = smul.u32 48, %s707_s9 }
  0x10   : > { %s538_s21 = smul.u32 48, %s87_s19  ;;  %p784_p13 = pnand %p557_p10, %p33_p5 }
  0x11   : > { %s96_s24 = scalar_lea.hbm %s995_s0, %s539_s20  ;;  %s88_s29 = scalar_lea.sflag [#allocation3], %s87_s19 }
  0x12   : > { %s97_s26 = sshll.u32 %s96_s24, 4  ;;  %s91_s27 = scalar_lea.vmem [#allocation2], %s538_s21  ;;  %s98_s26 = int_to_ptr.hbm [resolvable:$true] %s97_s26 }
  0x13   : > { %s99_s28 = sshll.u32 %s91_s27, 4  ;;  %s611_s30 = sshra.s32 %s98_s26, 4  ;;  %s100_s28 = int_to_ptr.vmem [resolvable:$true] %s99_s28  ;;  %s612_s30 = int_to_ptr.hbm [resolvable:$true] %s611_s30 }
  0x14   : > { %s613_s2 = scalar_lea.hbm %s612_s30, 48  ;;  %p615_p1 = pneg %p784_p13 }
  0x15   : > { %p614_p0 = scmp.ne.s32.totalorder %s612_s30, %s613_s2  ;;  %s618_s5 = scalar_lea.hbm %s995_s0, 96 }
  0x16   : > { %p619_p4 = scmp.lt.s32.totalorder %s612_s30, %s995_s0  ;;  %p620_p5 = scmp.lt.s32.totalorder %s618_s5, %s613_s2 }
  0x17   : > { %p616_p2 = pnand %p615_p1, %p614_p0 }
  0x18   : > { %p621_p7 = por %p620_p5, %p619_p4 }
  0x19   : > { %p617_p3 = pneg %p616_p2 }
  0x1b   : > { %p622_p8 = pnand %p621_p7, %p617_p3 }
  0x1d   : > { %625 = shalt.err (!%p622_p8)
}
  0x1e   : > { %s709_s14 = smov 128   ;;  %s710_s19 = smov 8  }
  0x1f   : > { %552 = dma.hbm_to_vmem [thread:$0]  (!%p784_p13), %s98_s26, 768, %s100_s28, %s88_s29, %s709_s14, %s709_s14, %s710_s19  }
  0x20   : > { %p528_p10 = scmp.ge.s32.totalorder %s707_s9, 1  ;;  %p107_p0 = scmp.lt.s32.totalorder %s707_s9, 3 }
  0x22   : > { %p108_p1 = pnand %p528_p10, %p107_p0 }
  0x23   : > { %s801_s20 = sand.u32 (!%p108_p1), 1, %s699_s7  }
  0x24   : > { %111 = sbr.rel (%p108_p1) target bundleno = 449 (0x1c1), region = 24  ;;  %s114_s22 = scalar_lea.sflag (!%p108_p1), [#allocation3], %s801_s20 }
  0x25   : > { %s540_s21 = smul.u32 (!%p108_p1), 48, %s801_s20 }
  0x27   : > { %s117_s23 = scalar_lea.vmem (!%p108_p1), [#allocation2], %s540_s21 }
  0x29   : > { %686 = dma.done.wait (%p764_p6), %s114_s22, 768  }
  0x2a   : > { %688 = vsyncadd (%p764_p6), %s114_s22, 4294966528  ;;  %s529_s24 = sshll.u32 %s801_s20, 6  ;;  %v810_v0 = vld [vmem:[%s117_s23 + $0x20] sm:$0xff]  ;;  %vm243_vm0 = vcmask 130048   ;;  %s711_s25 = smov 127   ;;  %v824_v2 = vld [vmem:[%s117_s23 + $0x28] sm:$0xff] }
  0x2b   : > { %v812_v1 = vld [vmem:[%s117_s23] sm:$0xff]  ;;  %195 = vrot.lane.b32.xlu1 %v810_v0, %s711_s25  ;;  %s815_s26 = scalar_lea.vmem [#allocation5], %s529_s24  ;;  %s712_s16 = smov 1   ;;  %v830_v3 = vld [vmem:[%s117_s23 + $0x8] sm:$0xff]  ;;  %v835_v4 = vld [vmem:[%s117_s23 + $0x10] sm:$0xff]  ;;  %v156_v9 = vrot.slane %v810_v0, 1 }
  0x2c   : > { %430 = vst.msk [vmem:[%s815_s26 + $0x20] sm:$0xff] %vm243_vm0, %v810_v0  ;;  %187 = vrot.lane.b32.xlu0 %v812_v1, %s711_s25  ;;  %212 = vrot.lane.b32.xlu2 %v812_v1, %s712_s16  ;;  %v840_v5 = vld [vmem:[%s117_s23 + $0x18] sm:$0xff]  ;;  %v151_v8 = vrot.slane %v830_v3, 1  ;;  %v157_v10 = vrot.slane %v824_v2, 1  ;;  %v150_v11 = vrot.slane %v812_v1, 1  ;;  %vm149_vm1 = vcmask 1046528  }
  0x2d   : > { %426 = vst.msk [vmem:[%s815_s26] sm:$0xff] %vm243_vm0, %v812_v1  ;;  %v153_v12 = vrot.slane %v835_v4, 1  ;;  %v154_v13 = vrot.slane %v840_v5, 1  ;;  %vm205_vm2 = vcmask 121856   ;;  %v175_v25 = vrot.slane %v810_v0, 7  ;;  %s537_s29 = sshll.u32 %s746_s10, 6 }
  0x2e   : > { %431 = vst.msk [vmem:[%s815_s26 + $0x28] sm:$0xff] %vm243_vm0, %v824_v2  ;;  %v158_v14 = vsel %vm149_vm1, %v156_v9, %v157_v10  ;;  %v152_v15 = vsel %vm149_vm1, %v150_v11, %v151_v8  ;;  %vm168_vm3 = vcmask 1040384   ;;  %v169_v30 = vrot.slane %v812_v1, 7  ;;  %s447_s3 = scalar_lea.hbm %s996_s1, %s537_s29  ;;  %s448_s4 = sshll.u32 %s815_s26, 4  ;;  %s449_s4 = int_to_ptr.vmem [resolvable:$true] %s448_s4 }
  0x2f   : > { %427 = vst.msk [vmem:[%s815_s26 + $0x8] sm:$0xff] %vm243_vm0, %v830_v3  ;;  %v241_v16 = vsub.f32 %v810_v0, %v158_v14  ;;  %v237_v17 = vsub.f32 %v812_v1, %v152_v15  ;;  %v155_v18 = vsel %vm149_vm1, %v153_v12, %v154_v13  ;;  %v186_v36 = vsel %vm168_vm3, 0.0, %v175_v25  ;;  %s450_s5 = sshll.u32 %s447_s3, 4  ;;  %s436_s10 = scalar_lea.sflag [#allocation4], %s801_s20  ;;  %s451_s5 = int_to_ptr.hbm [resolvable:$true] %s450_s5 }
  0x30   : > { %428 = vst.msk [vmem:[%s815_s26 + $0x10] sm:$0xff] %vm243_vm0, %v835_v4  ;;  %v239_v20 = vsub.f32 %v835_v4, %v155_v18  ;;  %v172_v37 = vrot.slane %v835_v4, 7  ;;  %v184_v41 = vsel %vm168_vm3, 0.0, %v169_v30  ;;  %v170_v43 = vrot.slane %v830_v3, 7  ;;  %s655_s11 = sshra.s32 %s451_s5, 4  ;;  %s661_s21 = scalar_lea.hbm %s996_s1, 128  ;;  %s656_s11 = int_to_ptr.hbm [resolvable:$true] %s655_s11 }
  0x31   : > { %429 = vst.msk [vmem:[%s815_s26 + $0x18] sm:$0xff] %vm243_vm0, %v840_v5  ;;  %v246_v21 = vsel %vm243_vm0, %v241_v16, -inf  ;;  %v244_v22 = vsel %vm243_vm0, %v237_v17, -inf  ;;  %v176_v44 = vrot.slane %v824_v2, 7  ;;  %v274_v45 = vsub.f32 %v186_v36, %v158_v14  ;;  %s657_s13 = scalar_lea.hbm %s656_s11, 64  ;;  %p662_p3 = scmp.lt.s32.totalorder %s656_s11, %s996_s1 }
  0x32   : > { %v247_v24 = vmax.f32 %v244_v22, %v246_v21  ;;  %v245_v28 = vsel %vm243_vm0, %v239_v20, -inf  ;;  %v270_v47 = vsub.f32 %v184_v41, %v152_v15  ;;  %v173_v48 = vrot.slane %v840_v5, 7  ;;  %p658_p6 = scmp.ne.s32.totalorder %s656_s11, %s657_s13  ;;  %p663_p4 = scmp.lt.s32.totalorder %s661_s21, %s657_s13 }
  0x33   : > { %197 = vrot.lane.b32.xlu1 %v824_v2, %s711_s25  ;;  %v185_v52 = vsel %vm168_vm3, 0.0, %v172_v37  ;;  %v165_v53 = vsel %vm149_vm1, %v151_v8, 0.0  ;;  %v167_v55 = vsel %vm149_vm1, %v157_v10, 0.0  ;;  %v177_v56 = vsel %vm168_vm3, %v175_v25, %v176_v44 }
  0x34   : > { %189 = vrot.lane.b32.xlu0 %v830_v3, %s711_s25  ;;  %214 = vrot.lane.b32.xlu2 %v830_v3, %s712_s16  ;;  %v248_v35 = vmax.f32 %v247_v24, %v245_v28  ;;  %v171_v57 = vsel %vm168_vm3, %v169_v30, %v170_v43  ;;  %v278_v58 = vsel %vm243_vm0, %v274_v45, -inf  ;;  %v166_v59 = vsel %vm149_vm1, %v154_v13, 0.0  ;;  %p659_p13 = pnand %p658_p6, %p771_p11  ;;  %p664_p5 = por %p663_p4, %p662_p3 }
  0x35   : > { %v272_v60 = vsub.f32 %v185_v52, %v155_v18  ;;  %v276_v61 = vsel %vm243_vm0, %v270_v47, -inf  ;;  %v174_v62 = vsel %vm168_vm3, %v172_v37, %v173_v48  ;;  %v238_v63 = vsub.f32 %v830_v3, %v165_v53 }
  0x36   : > { %v304_v49 = vmul.f32 %v248_v35, %v248_v35  ;;  %v271_v8 = vsub.f32 %v171_v57, %v165_v53  ;;  %vm230_vm4 = vcmask 7168   ;;  %v279_v9 = vmax.f32 %v276_v61, %v278_v58  ;;  %p660_p2 = pneg %p659_p13 }
  0x37   : > { %v277_v10 = vsel %vm243_vm0, %v272_v60, -inf  ;;  %v240_v11 = vsub.f32 %v840_v5, %v166_v59  ;;  %v249_v12 = vsel %vm243_vm0, %v238_v63, -inf  ;;  %v273_v13 = vsub.f32 %v174_v62, %v166_v59 }
  0x38   : > { %v281_v18 = vsel %vm243_vm0, %v271_v8, -inf  ;;  %p665_p7 = pnand %p664_p5, %p660_p2 }
  0x3b   : > { %222 = vrot.lane.b32.xlu1 %v824_v2, %s712_s16 }
  0x3c   : > { %220 = vrot.lane.b32.xlu0 %v810_v0, %s712_s16  ;;  %191 = vrot.lane.b32.xlu2 %v835_v4, %s711_s25 }
  0x43   : > { %216 = vrot.lane.b32.xlu1 %v835_v4, %s712_s16 }
  0x44   : > { %193 = vrot.lane.b32.xlu0 %v840_v5, %s711_s25  ;;  %218 = vrot.lane.b32.xlu2 %v840_v5, %s712_s16 }
  0x86   : > { %v854_v6 = vpop.permute.xlu2 %212 }
  0x87   : > { %v231_v24 = vsel %vm230_vm4, 0.0, %v854_v6 }
  0x8e   : > { %v856_v7 = vpop.permute.xlu2 %214 }
  0x8f   : > { %v232_v25 = vsel %vm230_vm4, 0.0, %v856_v7 }
  0x96   : > { %v192_v19 = vpop.permute.xlu2 %191 }
  0x97   : > { %v873_v23 = vsel %vm205_vm2, %v192_v19, 0.0 }
  0x98   : > { %v256_v29 = vsub.f32 %v873_v23, %v835_v4  ;;  %v275_v4 = vsub.f32 %v177_v56, %v167_v55 }
  0x9a   : > { %v261_v40 = vsel %vm243_vm0, %v256_v29, -inf  ;;  %v283_v17 = vsel %vm243_vm0, %v275_v4, -inf  ;;  %v282_v29 = vsel %vm243_vm0, %v273_v13, -inf }
  0x9b   : > { %v284_v30 = vmax.f32 %v281_v18, %v283_v17 }
  0x9d   : > { %v196_v26 = vpop.permute.xlu1 %195 }
  0x9e   : > { %v188_v27 = vpop.permute.xlu0 %187  ;;  %v881_v31 = vsel %vm205_vm2, %v196_v26, 0.0  ;;  %v280_v26 = vmax.f32 %v279_v9, %v277_v10  ;;  %v219_v37 = vpop.permute.xlu2 %218 }
  0x9f   : > { %v884_v32 = vsel %vm205_vm2, %v188_v27, 0.0  ;;  %v258_v33 = vsub.f32 %v881_v31, %v810_v0  ;;  %v250_v27 = vsel %vm243_vm0, %v240_v11, -inf }
  0xa0   : > { %v254_v34 = vsub.f32 %v884_v32, %v812_v1  ;;  %v242_v1 = vsub.f32 %v824_v2, %v167_v55  ;;  %v286_v6 = vsub.f32 %v884_v32, %v231_v24  ;;  %v334_v7 = vmul.f32 %v280_v26, %v280_v26 }
  0xa1   : > { %v262_v38 = vsel %vm243_vm0, %v258_v33, -inf }
  0xa2   : > { %v260_v39 = vsel %vm243_vm0, %v254_v34, -inf  ;;  %v251_v16 = vsel %vm243_vm0, %v242_v1, -inf }
  0xa3   : > { %v263_v42 = vmax.f32 %v260_v39, %v262_v38  ;;  %v252_v28 = vmax.f32 %v249_v12, %v251_v16 }
  0xa5   : > { %v264_v46 = vmax.f32 %v263_v42, %v261_v40  ;;  %v198_v50 = vpop.permute.xlu1 %197  ;;  %v234_v40 = vsel %vm230_vm4, 0.0, %v219_v37  ;;  %v253_v41 = vmax.f32 %v252_v28, %v250_v27  ;;  %v285_v42 = vmax.f32 %v284_v30, %v282_v29 }
  0xa6   : > { %v190_v51 = vpop.permute.xlu0 %189  ;;  %v211_v19 = vsel %vm205_vm2, %v198_v50, 0.0 }
  0xa7   : > { %v302_v54 = vmul.f32 %v264_v46, %v264_v46  ;;  %v207_v20 = vsel %vm205_vm2, %v190_v51, 0.0  ;;  %v259_v33 = vsub.f32 %v211_v19, %v824_v2  ;;  %v292_v46 = vsel %vm243_vm0, %v286_v6, -inf }
  0xa8   : > { %v255_v34 = vsub.f32 %v207_v20, %v830_v3  ;;  %v287_v39 = vsub.f32 %v207_v20, %v232_v25  ;;  %v305_v56 = vmul.f32 %v253_v41, %v253_v41  ;;  %v335_v60 = vmul.f32 %v285_v42, %v285_v42 }
  0xa9   : > { %v909_v0 = vadd.f32 %v304_v49, %v302_v54  ;;  %v267_v43 = vsel %vm243_vm0, %v259_v33, -inf }
  0xaa   : > { %v265_v44 = vsel %vm243_vm0, %v255_v34, -inf  ;;  %v297_v49 = vsel %vm243_vm0, %v287_v39, -inf }
  0xab   : > { %597 = vrsqrt.f32 %v909_v0  ;;  %v268_v53 = vmax.f32 %v265_v44, %v267_v43  ;;  %vm315_vm5 = vcmp.eq.f32.partialorder %v909_v0, inf  ;;  %v318_v33 = vand.u32 2147483648, %v909_v0 }
  0xac   : > { %vm317_vm6 = vcmp.eq.f32.partialorder %v909_v0, 0.0 }
  0xad   : > { %v223_v14 = vpop.permute.xlu1 %222 }
  0xae   : > { %v221_v15 = vpop.permute.xlu0 %220  ;;  %v236_v21 = vsel %vm230_vm4, 0.0, %v223_v14 }
  0xaf   : > { %v235_v22 = vsel %vm230_vm4, 0.0, %v221_v15  ;;  %v291_v35 = vsub.f32 %v211_v19, %v236_v21 }
  0xb0   : > { %v290_v36 = vsub.f32 %v881_v31, %v235_v22 }
  0xb1   : > { %v598_v38 = vpop.eup %597  ;;  %v299_v2 = vsel %vm243_vm0, %v291_v35, -inf }
  0xb2   : > { %v294_v3 = vsel %vm243_vm0, %v290_v36, -inf  ;;  %v309_v32 = vmul.f32 %v598_v38, %v909_v0  ;;  %v300_v54 = vmax.f32 %v297_v49, %v299_v2 }
  0xb3   : > { %v295_v55 = vmax.f32 %v292_v46, %v294_v3 }
  0xb4   : > { %v310_v61 = vmul.f32 %v598_v38, %v309_v32 }
  0xb5   : > { %v217_v45 = vpop.permute.xlu1 %216 }
  0xb6   : > { %v194_v31 = vpop.permute.xlu0 %193  ;;  %v233_v47 = vsel %vm230_vm4, 0.0, %v217_v45 }
  0xb7   : > { %v209_v48 = vsel %vm205_vm2, %v194_v31, 0.0  ;;  %v288_v50 = vsub.f32 %v873_v23, %v233_v47 }
  0xb8   : > { %v257_v51 = vsub.f32 %v209_v48, %v840_v5  ;;  %v289_v52 = vsub.f32 %v209_v48, %v234_v40  ;;  %v311_v5 = vmul.f32 0.5, %v310_v61 }
  0xb9   : > { %v293_v57 = vsel %vm243_vm0, %v288_v50, -inf }
  0xba   : > { %v266_v58 = vsel %vm243_vm0, %v257_v51, -inf  ;;  %v298_v59 = vsel %vm243_vm0, %v289_v52, -inf  ;;  %v296_v62 = vmax.f32 %v295_v55, %v293_v57  ;;  %v312_v12 = vsub.f32 1.5, %v311_v5 }
  0xbb   : > { %v269_v63 = vmax.f32 %v268_v53, %v266_v58  ;;  %v301_v1 = vmax.f32 %v300_v54, %v298_v59 }
  0xbc   : > { %v332_v4 = vmul.f32 %v296_v62, %v296_v62  ;;  %v313_v14 = vmul.f32 %v598_v38, %v312_v12 }
  0xbd   : > { %v303_v23 = vmul.f32 %v269_v63, %v269_v63  ;;  %v333_v8 = vmul.f32 %v301_v1, %v301_v1 }
  0xbe   : > { %v336_v9 = vadd.f32 %v334_v7, %v332_v4  ;;  %v314_v21 = vmul.f32 %v313_v14, %v909_v0 }
  0xbf   : > { %v307_v10 = vadd.f32 %v305_v56, %v303_v23  ;;  %v337_v11 = vadd.f32 %v335_v60, %v333_v8 }
  0xc0   : > { %599 = vrsqrt.f32 %v336_v9  ;;  %v316_v29 = vsel %vm315_vm5, %v909_v0, %v314_v21  ;;  %vm345_vm7 = vcmp.eq.f32.partialorder %v336_v9, inf  ;;  %vm347_vm8 = vcmp.eq.f32.partialorder %v336_v9, 0.0 }
  0xc1   : > { %601 = vrsqrt.f32 %v307_v10  ;;  %v319_v38 = vsel %vm317_vm6, %v318_v33, %v316_v29  ;;  %v348_v39 = vand.u32 2147483648, %v336_v9  ;;  %vm327_vm9 = vcmp.eq.f32.partialorder %v307_v10, inf }
  0xc2   : > { %603 = vrsqrt.f32 %v337_v11  ;;  %vm329_vm10 = vcmp.eq.f32.partialorder %v307_v10, 0.0  ;;  %v330_v41 = vand.u32 2147483648, %v307_v10  ;;  %vm357_vm11 = vcmp.eq.f32.partialorder %v337_v11, inf }
  0xc3   : > { %v360_v44 = vand.u32 2147483648, %v337_v11  ;;  %vm359_vm12 = vcmp.eq.f32.partialorder %v337_v11, 0.0 }
  0xc6   : > { %v600_v13 = vpop.eup %599 }
  0xc7   : > { %v602_v15 = vpop.eup %601  ;;  %v339_v16 = vmul.f32 %v600_v13, %v336_v9 }
  0xc8   : > { %v604_v17 = vpop.eup %603  ;;  %v321_v18 = vmul.f32 %v602_v15, %v307_v10 }
  0xc9   : > { %v340_v19 = vmul.f32 %v600_v13, %v339_v16  ;;  %v351_v20 = vmul.f32 %v604_v17, %v337_v11 }
  0xca   : > { %v322_v22 = vmul.f32 %v602_v15, %v321_v18 }
  0xcb   : > { %v341_v24 = vmul.f32 0.5, %v340_v19  ;;  %v352_v25 = vmul.f32 %v604_v17, %v351_v20 }
  0xcc   : > { %v323_v26 = vmul.f32 0.5, %v322_v22 }
  0xcd   : > { %v342_v27 = vsub.f32 1.5, %v341_v24  ;;  %v353_v28 = vmul.f32 0.5, %v352_v25 }
  0xce   : > { %v324_v30 = vsub.f32 1.5, %v323_v26 }
  0xcf   : > { %v343_v34 = vmul.f32 %v600_v13, %v342_v27  ;;  %v354_v35 = vsub.f32 1.5, %v353_v28 }
  0xd0   : > { %v325_v36 = vmul.f32 %v602_v15, %v324_v30 }
  0xd1   : > { %v344_v37 = vmul.f32 %v343_v34, %v336_v9  ;;  %v355_v6 = vmul.f32 %v604_v17, %v354_v35 }
  0xd2   : > { %v326_v7 = vmul.f32 %v325_v36, %v307_v10 }
  0xd3   : > { %v346_v40 = vsel %vm345_vm7, %v336_v9, %v344_v37  ;;  %v356_v42 = vmul.f32 %v355_v6, %v337_v11 }
  0xd4   : > { %v328_v43 = vsel %vm327_vm9, %v307_v10, %v326_v7  ;;  %v349_v2 = vsel %vm347_vm8, %v348_v39, %v346_v40 }
  0xd5   : > { %v358_v3 = vsel %vm357_vm11, %v337_v11, %v356_v42  ;;  %v331_v0 = vsel %vm329_vm10, %v330_v41, %v328_v43  ;;  %v362_v45 = vmax.f32 %v319_v38, %v349_v2 }
  0xd6   : > { %v361_v31 = vsel %vm359_vm12, %v360_v44, %v358_v3 }
  0xd7   : > { %v363_v46 = vmax.f32 %v331_v0, %v361_v31  ;;  %605 = vrsqrt.f32 %v362_v45  ;;  %vm371_vm13 = vcmp.eq.f32.partialorder %v362_v45, inf  ;;  %v374_v59 = vand.u32 2147483648, %v362_v45 }
  0xd8   : > { %vm373_vm14 = vcmp.eq.f32.partialorder %v362_v45, 0.0 }
  0xd9   : > { %607 = vrsqrt.f32 %v363_v46  ;;  %vm383_vm15 = vcmp.eq.f32.partialorder %v363_v46, inf  ;;  %v386_v63 = vand.u32 2147483648, %v363_v46  ;;  %vm385_vm1 = vcmp.eq.f32.partialorder %v363_v46, 0.0 }
  0xdd   : > { %v606_v32 = vpop.eup %605 }
  0xde   : > { %v365_v47 = vmul.f32 %v606_v32, %v362_v45 }
  0xdf   : > { %v608_v48 = vpop.eup %607 }
  0xe0   : > { %v366_v49 = vmul.f32 %v606_v32, %v365_v47  ;;  %v377_v50 = vmul.f32 %v608_v48, %v363_v46 }
  0xe2   : > { %v367_v51 = vmul.f32 0.5, %v366_v49  ;;  %v378_v52 = vmul.f32 %v608_v48, %v377_v50 }
  0xe4   : > { %v368_v53 = vsub.f32 1.5, %v367_v51  ;;  %v379_v54 = vmul.f32 0.5, %v378_v52 }
  0xe6   : > { %v369_v55 = vmul.f32 %v606_v32, %v368_v53  ;;  %v380_v56 = vsub.f32 1.5, %v379_v54 }
  0xe8   : > { %v370_v57 = vmul.f32 %v369_v55, %v362_v45  ;;  %v381_v58 = vmul.f32 %v608_v48, %v380_v56 }
  0xea   : > { %v372_v60 = vsel %vm371_vm13, %v362_v45, %v370_v57  ;;  %v382_v61 = vmul.f32 %v381_v58, %v363_v46 }
  0xeb   : > { %v375_v62 = vsel %vm373_vm14, %v374_v59, %v372_v60 }
  0xec   : > { %v384_v1 = vsel %vm383_vm15, %v363_v46, %v382_v61  ;;  %v401_v4 = vsel %vm243_vm0, %v375_v62, inf  ;;  %v388_v23 = vsel %vm243_vm0, %v375_v62, -inf }
  0xed   : > { %v387_v8 = vsel %vm385_vm1, %v386_v63, %v384_v1 }
  0xee   : > { %v402_v5 = vsel %vm243_vm0, %v387_v8, inf  ;;  %v389_v9 = vsel %vm243_vm0, %v387_v8, -inf }
  0xef   : > { %v403_v10 = vmin.f32 %v401_v4, %v402_v5  ;;  %v390_v11 = vmax.f32 %v388_v23, %v389_v9 }
  0xf1   : > { %404 = vmin.xlane.f32.xlu1 %v403_v10  ;;  %391 = vmax.xlane.f32.xlu0 %v390_v11 }
 0x164   : > { %v405_v12 = vpop.xlane.xlu1 %404  ;;  %v392_v13 = vpop.xlane.xlu0 %391 }
 0x165   : > { %v406_v14 = vrot.slane %v405_v12, 4  ;;  %v393_v15 = vrot.slane %v392_v13, 4 }
 0x167   : > { %v407_v16 = vmin.f32 %v405_v12, %v406_v14  ;;  %v394_v17 = vmax.f32 %v392_v13, %v393_v15 }
 0x169   : > { %v408_v18 = vrot.slane %v407_v16, 2  ;;  %v395_v19 = vrot.slane %v394_v17, 2 }
 0x16b   : > { %v409_v20 = vmin.f32 %v407_v16, %v408_v18  ;;  %v396_v21 = vmax.f32 %v394_v17, %v395_v19 }
 0x16d   : > { %v397_v22 = vrot.slane %v396_v21, 1  ;;  %v410_v24 = vrot.slane %v409_v20, 1 }
 0x16f   : > { %v398_v25 = vmax.f32 %v396_v21, %v397_v22  ;;  %v411_v26 = vmin.f32 %v409_v20, %v410_v24 }
 0x171   : > { %541 = vpush %v398_v25 }
 0x172   : > { %543 = vpush %v411_v26 }
 0x1a2   : > { %s542_s27 = spop %541 }
 0x1a3   : > { %v400_v27 = vstv %s542_s27  ;;  %s544_s28 = spop %543 }
 0x1a4   : > { %v413_v28 = vstv %s544_s28 }
 0x1a5   : > { %v414_v29 = vsub.f32 %v400_v27, %v413_v28  ;;  %v422_v38 = vsub.f32 %v375_v62, %v413_v28  ;;  %v423_v39 = vsub.f32 %v387_v8, %v413_v28 }
 0x1a7   : > { %609 = vrcp.f32 %v414_v29 }
 0x1ad   : > { %v610_v30 = vpop.eup %609 }
 0x1ae   : > { %v416_v33 = vmul.f32 %v610_v30, %v414_v29 }
 0x1b0   : > { %v417_v34 = vsub.f32 2.0, %v416_v33 }
 0x1b2   : > { %v418_v35 = vmul.f32 %v610_v30, %v417_v34 }
 0x1b4   : > { %v419_v36 = vmul.f32 %v418_v35, %v414_v29 }
 0x1b6   : > { %v420_v37 = vsub.f32 2.0, %v419_v36 }
 0x1b8   : > { %v421_v6 = vmul.f32 %v420_v37, %v418_v35 }
 0x1ba   : > { %v424_v7 = vmul.f32 %v422_v38, %v421_v6  ;;  %v425_v40 = vmul.f32 %v423_v39, %v421_v6 }
 0x1bc   : > { %530 = vst.msk [vmem:[%s815_s26 + $0x30] sm:$0xff] %vm243_vm0, %v424_v7 }
 0x1bd   : > { %531 = vst.msk [vmem:[%s815_s26 + $0x38] sm:$0xff] %vm243_vm0, %v425_v40 }
 0x1be   : > { %668 = shalt.err (!%p665_p7)
}
 0x1bf   : > { %s713_s20 = smov 128   ;;  %s714_s24 = smov 8  }
 0x1c0   : > { %547 = dma.vmem_to_hbm [thread:$0]  (%p771_p11), %s449_s4, 1024, %s451_s5, %s436_s10, %s713_s20, %s713_s20, %s714_s24  }
 0x1c1 PF: > { %s465_s25 = sand.u32 1, %s695_s6   ;;  %p554_p8 = pnand %p526_p9, %p775_p12 }
 0x1c2   : > { %s466_s26 = scalar_lea.sflag [#allocation4], %s465_s25 }
 0x1c3   : > { %p555_p10 = pneg %p554_p8 }
 0x1c5   : > { %690 = dma.done.wait (%p555_p10), %s466_s26, 1024  }
 0x1c6   : > { %692 = vsyncadd (%p555_p10), %s466_s26, 4294966272  ;;  %p14_p0 = scmp.ge.s32.totalorder %s750_s12, 4   ;;  %s1001_s6 = smov %s699_s7 }
 0x1c7   : > { %s1002_s7 = smov %s703_s8  ;;  %s1003_s8 = smov %s762_s15 }
 0x1c8   : > { %s1004_s9 = smov %s750_s12  ;;  %16 = sbr.rel (!%p14_p0) target bundleno = 5 (0x5), region = 70 }
 0x1cd   :  { %472 = vsyncpa [#allocation3], 1 }
 0x1ce   :  { %474 = vsyncpa [#allocation3 + $0x1], 1 }
 0x1cf   :  { %475 = vsyncpa [#allocation4], 1 }
 0x1d0   :  { %477 = vsyncpa [#allocation4 + $0x1], 1 }

</bundles_post_ra>
